<compile_context>
chip_gen: v5e
topology: v5e:2x2
jax: 0.10.0
libtpu: 0.0.40
codegen_flags: <defaults>
</compile_context>

<pallas_src>
import jax
import jax.numpy as jnp
from jax import lax
from jax.experimental import pallas as pl
from jax.experimental.pallas import tpu as pltpu


def lstm_kernel(x_ref, wih_ref, whh_ref, b_ref, wout_ref, bout_ref,
                o_ref, gx_sc, hs_sc):
    """Prologue matmul -> unrolled vreg-carried recurrence -> VPU epilogue."""
    T = x_ref.shape[0]
    H = whh_ref.shape[0]

    # ---- prologue: gates_x = seq @ W_ih^T + (b_ih + b_hh) ----------------
    # One well-shaped MXU matmul; removes the x-projection and the bias add
    # from the serial per-step critical path.
    gx_sc[...] = (jnp.dot(x_ref[...], wih_ref[...],
                          preferred_element_type=jnp.float32) + b_ref[...])

    # ---- hoist the recurrent weight out of the unrolled loop --------------
    # Loaded once (~4 vregs); the per-step body then only touches vregs plus
    # a single lane-dense (1,4H) gates_x row.
    whh = whh_ref[...]                                       # (H, 4H)

    # ---- recurrence: h/c carried in vregs, only (1,H)@(H,4H) + gates ------
    h0 = jnp.zeros((1, H), jnp.float32)
    c0 = jnp.zeros((1, H), jnp.float32)

    def step(t, carry):
        h_prev, c_prev = carry                               # (1,H) each, vregs
        gates = gx_sc[pl.ds(t, 1), :] + jnp.dot(
            h_prev, whh, preferred_element_type=jnp.float32)  # (1, 4H)

        # Full-vreg nonlinearities (2 EUP passes), then lane-slice selection.
        # Gate order matches PyTorch: [i, f, g, o] along the 4H axis.
        sig = jax.nn.sigmoid(gates)                          # (1, 4H)
        th = jnp.tanh(gates)                                 # (1, 4H)
        i_g = sig[:, 0 * H:1 * H]
        f_g = sig[:, 1 * H:2 * H]
        g_g = th[:, 2 * H:3 * H]
        o_g = sig[:, 3 * H:4 * H]

        c_new = f_g * c_prev + i_g * g_g
        h_new = o_g * jnp.tanh(c_new)                        # 3rd EUP pass

        hs_sc[pl.ds(t, 1), :] = h_new                        # lane-dense (1,H)
        return (h_new, c_new)

    # T is small and static -> fully unroll so LLO can overlap MXU/EUP/VPU
    # across iterations (only the true h/c vreg dependency serializes).
    lax.fori_loop(0, T, step, (h0, c0), unroll=True)

    # ---- epilogue: out = sum(hs * w_out, -1) + b_out on VPU/XLU -----------
    # Avoids an N=1 MXU pass; one broadcast multiply + lane reduce + store.
    o_ref[...] = (jnp.sum(hs_sc[...] * wout_ref[...], axis=-1, keepdims=True)
                  + bout_ref[...])


def lstm_forward(seq, w_ih, w_hh, b_ih, b_hh, w_out, b_out):
    """seq: (T, D).  w_ih: (4H, D), w_hh: (4H, H), b_*: (4H,),
       w_out: (1, H), b_out: (1,).  Returns (T, 1)."""
    T, D = seq.shape
    H = w_hh.shape[1]

    wih_t = jnp.transpose(w_ih).astype(jnp.float32)          # (D, 4H)
    whh_t = jnp.transpose(w_hh).astype(jnp.float32)          # (H, 4H)
    b = (b_ih + b_hh).reshape(1, 4 * H).astype(jnp.float32)  # (1, 4H)
    wout = w_out.reshape(1, H).astype(jnp.float32)           # (1, H) row
    bout = b_out.reshape(1, 1).astype(jnp.float32)           # (1, 1)

    full = lambda i: (0, 0)   # single grid point; everything resident in VMEM
    return pl.pallas_call(
        lstm_kernel,
        out_shape=jax.ShapeDtypeStruct((T, 1), jnp.float32),
        grid_spec=pltpu.PrefetchScalarGridSpec(
            num_scalar_prefetch=0,
            grid=(1,),
            in_specs=[
                pl.BlockSpec((T, D), full),          # seq
                pl.BlockSpec((D, 4 * H), full),      # W_ih^T
                pl.BlockSpec((H, 4 * H), full),      # W_hh^T
                pl.BlockSpec((1, 4 * H), full),      # combined bias
                pl.BlockSpec((1, H), full),          # w_out row
                pl.BlockSpec((1, 1), full),          # b_out
            ],
            out_specs=pl.BlockSpec((T, 1), full),
            scratch_shapes=[
                pltpu.VMEM((T, 4 * H), jnp.float32),  # gates_x (prologue result)
                pltpu.VMEM((T, H), jnp.float32),      # hidden-state history hs
            ],
        ),
        compiler_params=pltpu.CompilerParams(
            dimension_semantics=("arbitrary",)),     # recurrence is sequential
    )(seq.astype(jnp.float32), wih_t, whh_t, b, wout, bout)


def lstm_reference(seq, w_ih, w_hh, b_ih, b_hh, w_out, b_out):
    """Pure-JAX reference mirroring torch.nn.LSTM (1 layer, batch=1)."""
    H = w_hh.shape[1]
    b = b_ih + b_hh

    def step(carry, x_t):
        h, c = carry
        gates = x_t @ w_ih.T + h @ w_hh.T + b
        i = jax.nn.sigmoid(gates[0 * H:1 * H])
        f = jax.nn.sigmoid(gates[1 * H:2 * H])
        g = jnp.tanh(gates[2 * H:3 * H])
        o = jax.nn.sigmoid(gates[3 * H:4 * H])
        c = f * c + i * g
        h = o * jnp.tanh(c)
        return (h, c), h

    (_, _), hs = jax.lax.scan(step, (jnp.zeros(H), jnp.zeros(H)), seq)
    return hs @ w_out.T + b_out


if __name__ == "__main__":
    T, D, H = 8, 16, 32      # seq len, input_size, hidden_size

    key = jax.random.PRNGKey(0)
    ks = jax.random.split(key, 7)
    bound = 1.0 / jnp.sqrt(H)
    u = lambda k, shape: jax.random.uniform(k, shape, jnp.float32, -bound, bound)

    seq   = jax.random.normal(ks[0], (T, D), jnp.float32)
    w_ih  = u(ks[1], (4 * H, D))    # PyTorch weight_ih_l0, gate order [i,f,g,o]
    w_hh  = u(ks[2], (4 * H, H))    # weight_hh_l0
    b_ih  = u(ks[3], (4 * H,))
    b_hh  = u(ks[4], (4 * H,))
    w_out = u(ks[5], (1, H))        # nn.Linear(hidden, 1)
    b_out = u(ks[6], (1,))

    out = lstm_forward(seq, w_ih, w_hh, b_ih, b_hh, w_out, b_out)
    out = jax.block_until_ready(out)

    ref = lstm_reference(seq, w_ih, w_hh, b_ih, b_hh, w_out, b_out)
    assert out.shape == (T, 1)
    assert jnp.allclose(out, ref, atol=1e-5, rtol=1e-5), (out, ref)

    print("KERNEL_OK")
</pallas_src>

<mosaic_0001>
module attributes {stable_mosaic.version = 11 : i64} {
  func.func @lstm_kernel(%arg0: i32, %arg1: memref<8x16xf32, #tpu.memory_space<vmem>>, %arg2: memref<16x128xf32, #tpu.memory_space<vmem>>, %arg3: memref<32x128xf32, #tpu.memory_space<vmem>>, %arg4: memref<1x128xf32, #tpu.memory_space<vmem>>, %arg5: memref<1x32xf32, #tpu.memory_space<vmem>>, %arg6: memref<1x1xf32, #tpu.memory_space<vmem>>, %arg7: memref<8x1xf32, #tpu.memory_space<vmem>>, %arg8: memref<8x128xf32, #tpu.memory_space<vmem>>, %arg9: memref<8x32xf32, #tpu.memory_space<vmem>>) attributes {dimension_semantics = [#tpu.dimension_semantics<arbitrary>], iteration_bounds = array<i64: 1>, scalar_prefetch = 0 : i64, scratch_operands = 2 : i64, tpu.core_type = #tpu.core_type<tc>, window_params = [{pipeline_mode = #tpu.pipeline_mode<synchronous>, transform_indices = @transform_0, window_bounds = array<i64: 8, 16>}, {pipeline_mode = #tpu.pipeline_mode<synchronous>, transform_indices = @transform_1, window_bounds = array<i64: 16, 128>}, {pipeline_mode = #tpu.pipeline_mode<synchronous>, transform_indices = @transform_2, window_bounds = array<i64: 32, 128>}, {pipeline_mode = #tpu.pipeline_mode<synchronous>, transform_indices = @transform_3, window_bounds = array<i64: 1, 128>}, {pipeline_mode = #tpu.pipeline_mode<synchronous>, transform_indices = @transform_4, window_bounds = array<i64: 1, 32>}, {pipeline_mode = #tpu.pipeline_mode<synchronous>, transform_indices = @transform_5, window_bounds = array<i64: 1, 1>}, {pipeline_mode = #tpu.pipeline_mode<synchronous>, transform_indices = @transform_6, window_bounds = array<i64: 8, 1>}]} {
    %c0 = arith.constant 0 : index
    %c0_0 = arith.constant 0 : index
    %0 = vector.load %arg1[%c0, %c0_0] : memref<8x16xf32, #tpu.memory_space<vmem>>, vector<8x16xf32>
    %c0_1 = arith.constant 0 : index
    %c0_2 = arith.constant 0 : index
    %1 = vector.load %arg2[%c0_1, %c0_2] : memref<16x128xf32, #tpu.memory_space<vmem>>, vector<16x128xf32>
    %cst = arith.constant dense<0.000000e+00> : vector<8x128xf32>
    %2 = tpu.matmul %0, %1, %cst {dimension_numbers = #tpu.dot_dimension_numbers<[1], [0], [0], [1], [0, 0, 1, 1], [], []>} : vector<8x16xf32>, vector<16x128xf32>, vector<8x128xf32> -> vector<8x128xf32>
    %c0_3 = arith.constant 0 : index
    %c0_4 = arith.constant 0 : index
    %3 = vector.load %arg4[%c0_3, %c0_4] : memref<1x128xf32, #tpu.memory_space<vmem>>, vector<1x128xf32>
    %4 = vector.broadcast %3 : vector<1x128xf32> to vector<8x128xf32>
    %5 = arith.addf %2, %4 : vector<8x128xf32>
    %c0_5 = arith.constant 0 : index
    %c0_6 = arith.constant 0 : index
    %6 = vector.load %arg8[%c0_5, %c0_6] : memref<8x128xf32, #tpu.memory_space<vmem>>, vector<8x128xf32>
    tpu.vector_store %arg8[%c0_5, %c0_6], %5 {strides = array<i32>} : memref<8x128xf32, #tpu.memory_space<vmem>>, vector<8x128xf32>,
    %c0_7 = arith.constant 0 : index
    %c0_8 = arith.constant 0 : index
    %7 = vector.load %arg3[%c0_7, %c0_8] : memref<32x128xf32, #tpu.memory_space<vmem>>, vector<32x128xf32>
    %cst_9 = arith.constant 0.000000e+00 : f32
    %8 = vector.broadcast %cst_9 : f32 to vector<1x32xf32>
    %cst_10 = arith.constant 0.000000e+00 : f32
    %9 = vector.broadcast %cst_10 : f32 to vector<1x32xf32>
    %c0_i32 = arith.constant 0 : i32
    %10 = arith.index_cast %c0_i32 : i32 to index
    %c0_11 = arith.constant 0 : index
    %11 = vector.load %arg8[%10, %c0_11] : memref<8x128xf32, #tpu.memory_space<vmem>>, vector<1x128xf32>
    %cst_12 = arith.constant dense<0.000000e+00> : vector<1x128xf32>
    %12 = tpu.matmul %8, %7, %cst_12 {dimension_numbers = #tpu.dot_dimension_numbers<[1], [0], [0], [1], [0, 0, 1, 1], [], []>} : vector<1x32xf32>, vector<32x128xf32>, vector<1x128xf32> -> vector<1x128xf32>
    %13 = arith.addf %11, %12 : vector<1x128xf32>
    %14 = arith.negf %13 : vector<1x128xf32>
    %15 = math.exp %14 : vector<1x128xf32>
    %cst_13 = arith.constant 1.000000e+00 : f32
    %16 = vector.broadcast %cst_13 : f32 to vector<1x128xf32>
    %17 = arith.addf %16, %15 : vector<1x128xf32>
    %18 = arith.divf %16, %17 : vector<1x128xf32>
    %19 = math.tanh %13 : vector<1x128xf32>
    %20 = vector.extract_strided_slice %18 {offsets = [0, 0], sizes = [1, 32], strides = [1, 1]} : vector<1x128xf32> to vector<1x32xf32>
    %21 = vector.extract_strided_slice %18 {offsets = [0, 32], sizes = [1, 32], strides = [1, 1]} : vector<1x128xf32> to vector<1x32xf32>
    %22 = vector.extract_strided_slice %19 {offsets = [0, 64], sizes = [1, 32], strides = [1, 1]} : vector<1x128xf32> to vector<1x32xf32>
    %23 = vector.extract_strided_slice %18 {offsets = [0, 96], sizes = [1, 32], strides = [1, 1]} : vector<1x128xf32> to vector<1x32xf32>
    %24 = arith.mulf %21, %9 : vector<1x32xf32>
    %25 = arith.mulf %20, %22 : vector<1x32xf32>
    %26 = arith.addf %24, %25 : vector<1x32xf32>
    %27 = math.tanh %26 : vector<1x32xf32>
    %28 = arith.mulf %23, %27 : vector<1x32xf32>
    %29 = arith.index_cast %c0_i32 : i32 to index
    %c0_14 = arith.constant 0 : index
    %30 = vector.load %arg9[%29, %c0_14] : memref<8x32xf32, #tpu.memory_space<vmem>>, vector<1x32xf32>
    tpu.vector_store %arg9[%29, %c0_14], %28 {strides = array<i32>} : memref<8x32xf32, #tpu.memory_space<vmem>>, vector<1x32xf32>,
    %c1_i32 = arith.constant 1 : i32
    %31 = arith.index_cast %c1_i32 : i32 to index
    %c0_15 = arith.constant 0 : index
    %32 = vector.load %arg8[%31, %c0_15] : memref<8x128xf32, #tpu.memory_space<vmem>>, vector<1x128xf32>
    %cst_16 = arith.constant dense<0.000000e+00> : vector<1x128xf32>
    %33 = tpu.matmul %28, %7, %cst_16 {dimension_numbers = #tpu.dot_dimension_numbers<[1], [0], [0], [1], [0, 0, 1, 1], [], []>} : vector<1x32xf32>, vector<32x128xf32>, vector<1x128xf32> -> vector<1x128xf32>
    %34 = arith.addf %32, %33 : vector<1x128xf32>
    %35 = arith.negf %34 : vector<1x128xf32>
    %36 = math.exp %35 : vector<1x128xf32>
    %cst_17 = arith.constant 1.000000e+00 : f32
    %37 = vector.broadcast %cst_17 : f32 to vector<1x128xf32>
    %38 = arith.addf %37, %36 : vector<1x128xf32>
    %39 = arith.divf %37, %38 : vector<1x128xf32>
    %40 = math.tanh %34 : vector<1x128xf32>
    %41 = vector.extract_strided_slice %39 {offsets = [0, 0], sizes = [1, 32], strides = [1, 1]} : vector<1x128xf32> to vector<1x32xf32>
    %42 = vector.extract_strided_slice %39 {offsets = [0, 32], sizes = [1, 32], strides = [1, 1]} : vector<1x128xf32> to vector<1x32xf32>
    %43 = vector.extract_strided_slice %40 {offsets = [0, 64], sizes = [1, 32], strides = [1, 1]} : vector<1x128xf32> to vector<1x32xf32>
    %44 = vector.extract_strided_slice %39 {offsets = [0, 96], sizes = [1, 32], strides = [1, 1]} : vector<1x128xf32> to vector<1x32xf32>
    %45 = arith.mulf %42, %26 : vector<1x32xf32>
    %46 = arith.mulf %41, %43 : vector<1x32xf32>
    %47 = arith.addf %45, %46 : vector<1x32xf32>
    %48 = math.tanh %47 : vector<1x32xf32>
    %49 = arith.mulf %44, %48 : vector<1x32xf32>
    %50 = arith.index_cast %c1_i32 : i32 to index
    %c0_18 = arith.constant 0 : index
    %51 = vector.load %arg9[%50, %c0_18] : memref<8x32xf32, #tpu.memory_space<vmem>>, vector<1x32xf32>
    tpu.vector_store %arg9[%50, %c0_18], %49 {strides = array<i32>} : memref<8x32xf32, #tpu.memory_space<vmem>>, vector<1x32xf32>,
    %c2_i32 = arith.constant 2 : i32
    %52 = arith.index_cast %c2_i32 : i32 to index
    %c0_19 = arith.constant 0 : index
    %53 = vector.load %arg8[%52, %c0_19] : memref<8x128xf32, #tpu.memory_space<vmem>>, vector<1x128xf32>
    %cst_20 = arith.constant dense<0.000000e+00> : vector<1x128xf32>
    %54 = tpu.matmul %49, %7, %cst_20 {dimension_numbers = #tpu.dot_dimension_numbers<[1], [0], [0], [1], [0, 0, 1, 1], [], []>} : vector<1x32xf32>, vector<32x128xf32>, vector<1x128xf32> -> vector<1x128xf32>
    %55 = arith.addf %53, %54 : vector<1x128xf32>
    %56 = arith.negf %55 : vector<1x128xf32>
    %57 = math.exp %56 : vector<1x128xf32>
    %cst_21 = arith.constant 1.000000e+00 : f32
    %58 = vector.broadcast %cst_21 : f32 to vector<1x128xf32>
    %59 = arith.addf %58, %57 : vector<1x128xf32>
    %60 = arith.divf %58, %59 : vector<1x128xf32>
    %61 = math.tanh %55 : vector<1x128xf32>
    %62 = vector.extract_strided_slice %60 {offsets = [0, 0], sizes = [1, 32], strides = [1, 1]} : vector<1x128xf32> to vector<1x32xf32>
    %63 = vector.extract_strided_slice %60 {offsets = [0, 32], sizes = [1, 32], strides = [1, 1]} : vector<1x128xf32> to vector<1x32xf32>
    %64 = vector.extract_strided_slice %61 {offsets = [0, 64], sizes = [1, 32], strides = [1, 1]} : vector<1x128xf32> to vector<1x32xf32>
    %65 = vector.extract_strided_slice %60 {offsets = [0, 96], sizes = [1, 32], strides = [1, 1]} : vector<1x128xf32> to vector<1x32xf32>
    %66 = arith.mulf %63, %47 : vector<1x32xf32>
    %67 = arith.mulf %62, %64 : vector<1x32xf32>
    %68 = arith.addf %66, %67 : vector<1x32xf32>
    %69 = math.tanh %68 : vector<1x32xf32>
    %70 = arith.mulf %65, %69 : vector<1x32xf32>
    %71 = arith.index_cast %c2_i32 : i32 to index
    %c0_22 = arith.constant 0 : index
    %72 = vector.load %arg9[%71, %c0_22] : memref<8x32xf32, #tpu.memory_space<vmem>>, vector<1x32xf32>
    tpu.vector_store %arg9[%71, %c0_22], %70 {strides = array<i32>} : memref<8x32xf32, #tpu.memory_space<vmem>>, vector<1x32xf32>,
    %c3_i32 = arith.constant 3 : i32
    %73 = arith.index_cast %c3_i32 : i32 to index
    %c0_23 = arith.constant 0 : index
    %74 = vector.load %arg8[%73, %c0_23] : memref<8x128xf32, #tpu.memory_space<vmem>>, vector<1x128xf32>
    %cst_24 = arith.constant dense<0.000000e+00> : vector<1x128xf32>
    %75 = tpu.matmul %70, %7, %cst_24 {dimension_numbers = #tpu.dot_dimension_numbers<[1], [0], [0], [1], [0, 0, 1, 1], [], []>} : vector<1x32xf32>, vector<32x128xf32>, vector<1x128xf32> -> vector<1x128xf32>
    %76 = arith.addf %74, %75 : vector<1x128xf32>
    %77 = arith.negf %76 : vector<1x128xf32>
    %78 = math.exp %77 : vector<1x128xf32>
    %cst_25 = arith.constant 1.000000e+00 : f32
    %79 = vector.broadcast %cst_25 : f32 to vector<1x128xf32>
    %80 = arith.addf %79, %78 : vector<1x128xf32>
    %81 = arith.divf %79, %80 : vector<1x128xf32>
    %82 = math.tanh %76 : vector<1x128xf32>
    %83 = vector.extract_strided_slice %81 {offsets = [0, 0], sizes = [1, 32], strides = [1, 1]} : vector<1x128xf32> to vector<1x32xf32>
    %84 = vector.extract_strided_slice %81 {offsets = [0, 32], sizes = [1, 32], strides = [1, 1]} : vector<1x128xf32> to vector<1x32xf32>
    %85 = vector.extract_strided_slice %82 {offsets = [0, 64], sizes = [1, 32], strides = [1, 1]} : vector<1x128xf32> to vector<1x32xf32>
    %86 = vector.extract_strided_slice %81 {offsets = [0, 96], sizes = [1, 32], strides = [1, 1]} : vector<1x128xf32> to vector<1x32xf32>
    %87 = arith.mulf %84, %68 : vector<1x32xf32>
    %88 = arith.mulf %83, %85 : vector<1x32xf32>
    %89 = arith.addf %87, %88 : vector<1x32xf32>
    %90 = math.tanh %89 : vector<1x32xf32>
    %91 = arith.mulf %86, %90 : vector<1x32xf32>
    %92 = arith.index_cast %c3_i32 : i32 to index
    %c0_26 = arith.constant 0 : index
    %93 = vector.load %arg9[%92, %c0_26] : memref<8x32xf32, #tpu.memory_space<vmem>>, vector<1x32xf32>
    tpu.vector_store %arg9[%92, %c0_26], %91 {strides = array<i32>} : memref<8x32xf32, #tpu.memory_space<vmem>>, vector<1x32xf32>,
    %c4_i32 = arith.constant 4 : i32
    %94 = arith.index_cast %c4_i32 : i32 to index
    %c0_27 = arith.constant 0 : index
    %95 = vector.load %arg8[%94, %c0_27] : memref<8x128xf32, #tpu.memory_space<vmem>>, vector<1x128xf32>
    %cst_28 = arith.constant dense<0.000000e+00> : vector<1x128xf32>
    %96 = tpu.matmul %91, %7, %cst_28 {dimension_numbers = #tpu.dot_dimension_numbers<[1], [0], [0], [1], [0, 0, 1, 1], [], []>} : vector<1x32xf32>, vector<32x128xf32>, vector<1x128xf32> -> vector<1x128xf32>
    %97 = arith.addf %95, %96 : vector<1x128xf32>
    %98 = arith.negf %97 : vector<1x128xf32>
    %99 = math.exp %98 : vector<1x128xf32>
    %cst_29 = arith.constant 1.000000e+00 : f32
    %100 = vector.broadcast %cst_29 : f32 to vector<1x128xf32>
    %101 = arith.addf %100, %99 : vector<1x128xf32>
    %102 = arith.divf %100, %101 : vector<1x128xf32>
    %103 = math.tanh %97 : vector<1x128xf32>
    %104 = vector.extract_strided_slice %102 {offsets = [0, 0], sizes = [1, 32], strides = [1, 1]} : vector<1x128xf32> to vector<1x32xf32>
    %105 = vector.extract_strided_slice %102 {offsets = [0, 32], sizes = [1, 32], strides = [1, 1]} : vector<1x128xf32> to vector<1x32xf32>
    %106 = vector.extract_strided_slice %103 {offsets = [0, 64], sizes = [1, 32], strides = [1, 1]} : vector<1x128xf32> to vector<1x32xf32>
    %107 = vector.extract_strided_slice %102 {offsets = [0, 96], sizes = [1, 32], strides = [1, 1]} : vector<1x128xf32> to vector<1x32xf32>
    %108 = arith.mulf %105, %89 : vector<1x32xf32>
    %109 = arith.mulf %104, %106 : vector<1x32xf32>
    %110 = arith.addf %108, %109 : vector<1x32xf32>
    %111 = math.tanh %110 : vector<1x32xf32>
    %112 = arith.mulf %107, %111 : vector<1x32xf32>
    %113 = arith.index_cast %c4_i32 : i32 to index
    %c0_30 = arith.constant 0 : index
    %114 = vector.load %arg9[%113, %c0_30] : memref<8x32xf32, #tpu.memory_space<vmem>>, vector<1x32xf32>
    tpu.vector_store %arg9[%113, %c0_30], %112 {strides = array<i32>} : memref<8x32xf32, #tpu.memory_space<vmem>>, vector<1x32xf32>,
    %c5_i32 = arith.constant 5 : i32
    %115 = arith.index_cast %c5_i32 : i32 to index
    %c0_31 = arith.constant 0 : index
    %116 = vector.load %arg8[%115, %c0_31] : memref<8x128xf32, #tpu.memory_space<vmem>>, vector<1x128xf32>
    %cst_32 = arith.constant dense<0.000000e+00> : vector<1x128xf32>
    %117 = tpu.matmul %112, %7, %cst_32 {dimension_numbers = #tpu.dot_dimension_numbers<[1], [0], [0], [1], [0, 0, 1, 1], [], []>} : vector<1x32xf32>, vector<32x128xf32>, vector<1x128xf32> -> vector<1x128xf32>
    %118 = arith.addf %116, %117 : vector<1x128xf32>
    %119 = arith.negf %118 : vector<1x128xf32>
    %120 = math.exp %119 : vector<1x128xf32>
    %cst_33 = arith.constant 1.000000e+00 : f32
    %121 = vector.broadcast %cst_33 : f32 to vector<1x128xf32>
    %122 = arith.addf %121, %120 : vector<1x128xf32>
    %123 = arith.divf %121, %122 : vector<1x128xf32>
    %124 = math.tanh %118 : vector<1x128xf32>
    %125 = vector.extract_strided_slice %123 {offsets = [0, 0], sizes = [1, 32], strides = [1, 1]} : vector<1x128xf32> to vector<1x32xf32>
    %126 = vector.extract_strided_slice %123 {offsets = [0, 32], sizes = [1, 32], strides = [1, 1]} : vector<1x128xf32> to vector<1x32xf32>
    %127 = vector.extract_strided_slice %124 {offsets = [0, 64], sizes = [1, 32], strides = [1, 1]} : vector<1x128xf32> to vector<1x32xf32>
    %128 = vector.extract_strided_slice %123 {offsets = [0, 96], sizes = [1, 32], strides = [1, 1]} : vector<1x128xf32> to vector<1x32xf32>
    %129 = arith.mulf %126, %110 : vector<1x32xf32>
    %130 = arith.mulf %125, %127 : vector<1x32xf32>
    %131 = arith.addf %129, %130 : vector<1x32xf32>
    %132 = math.tanh %131 : vector<1x32xf32>
    %133 = arith.mulf %128, %132 : vector<1x32xf32>
    %134 = arith.index_cast %c5_i32 : i32 to index
    %c0_34 = arith.constant 0 : index
    %135 = vector.load %arg9[%134, %c0_34] : memref<8x32xf32, #tpu.memory_space<vmem>>, vector<1x32xf32>
    tpu.vector_store %arg9[%134, %c0_34], %133 {strides = array<i32>} : memref<8x32xf32, #tpu.memory_space<vmem>>, vector<1x32xf32>,
    %c6_i32 = arith.constant 6 : i32
    %136 = arith.index_cast %c6_i32 : i32 to index
    %c0_35 = arith.constant 0 : index
    %137 = vector.load %arg8[%136, %c0_35] : memref<8x128xf32, #tpu.memory_space<vmem>>, vector<1x128xf32>
    %cst_36 = arith.constant dense<0.000000e+00> : vector<1x128xf32>
    %138 = tpu.matmul %133, %7, %cst_36 {dimension_numbers = #tpu.dot_dimension_numbers<[1], [0], [0], [1], [0, 0, 1, 1], [], []>} : vector<1x32xf32>, vector<32x128xf32>, vector<1x128xf32> -> vector<1x128xf32>
    %139 = arith.addf %137, %138 : vector<1x128xf32>
    %140 = arith.negf %139 : vector<1x128xf32>
    %141 = math.exp %140 : vector<1x128xf32>
    %cst_37 = arith.constant 1.000000e+00 : f32
    %142 = vector.broadcast %cst_37 : f32 to vector<1x128xf32>
    %143 = arith.addf %142, %141 : vector<1x128xf32>
    %144 = arith.divf %142, %143 : vector<1x128xf32>
    %145 = math.tanh %139 : vector<1x128xf32>
    %146 = vector.extract_strided_slice %144 {offsets = [0, 0], sizes = [1, 32], strides = [1, 1]} : vector<1x128xf32> to vector<1x32xf32>
    %147 = vector.extract_strided_slice %144 {offsets = [0, 32], sizes = [1, 32], strides = [1, 1]} : vector<1x128xf32> to vector<1x32xf32>
    %148 = vector.extract_strided_slice %145 {offsets = [0, 64], sizes = [1, 32], strides = [1, 1]} : vector<1x128xf32> to vector<1x32xf32>
    %149 = vector.extract_strided_slice %144 {offsets = [0, 96], sizes = [1, 32], strides = [1, 1]} : vector<1x128xf32> to vector<1x32xf32>
    %150 = arith.mulf %147, %131 : vector<1x32xf32>
    %151 = arith.mulf %146, %148 : vector<1x32xf32>
    %152 = arith.addf %150, %151 : vector<1x32xf32>
    %153 = math.tanh %152 : vector<1x32xf32>
    %154 = arith.mulf %149, %153 : vector<1x32xf32>
    %155 = arith.index_cast %c6_i32 : i32 to index
    %c0_38 = arith.constant 0 : index
    %156 = vector.load %arg9[%155, %c0_38] : memref<8x32xf32, #tpu.memory_space<vmem>>, vector<1x32xf32>
    tpu.vector_store %arg9[%155, %c0_38], %154 {strides = array<i32>} : memref<8x32xf32, #tpu.memory_space<vmem>>, vector<1x32xf32>,
    %c7_i32 = arith.constant 7 : i32
    %157 = arith.index_cast %c7_i32 : i32 to index
    %c0_39 = arith.constant 0 : index
    %158 = vector.load %arg8[%157, %c0_39] : memref<8x128xf32, #tpu.memory_space<vmem>>, vector<1x128xf32>
    %cst_40 = arith.constant dense<0.000000e+00> : vector<1x128xf32>
    %159 = tpu.matmul %154, %7, %cst_40 {dimension_numbers = #tpu.dot_dimension_numbers<[1], [0], [0], [1], [0, 0, 1, 1], [], []>} : vector<1x32xf32>, vector<32x128xf32>, vector<1x128xf32> -> vector<1x128xf32>
    %160 = arith.addf %158, %159 : vector<1x128xf32>
    %161 = arith.negf %160 : vector<1x128xf32>
    %162 = math.exp %161 : vector<1x128xf32>
    %cst_41 = arith.constant 1.000000e+00 : f32
    %163 = vector.broadcast %cst_41 : f32 to vector<1x128xf32>
    %164 = arith.addf %163, %162 : vector<1x128xf32>
    %165 = arith.divf %163, %164 : vector<1x128xf32>
    %166 = math.tanh %160 : vector<1x128xf32>
    %167 = vector.extract_strided_slice %165 {offsets = [0, 0], sizes = [1, 32], strides = [1, 1]} : vector<1x128xf32> to vector<1x32xf32>
    %168 = vector.extract_strided_slice %165 {offsets = [0, 32], sizes = [1, 32], strides = [1, 1]} : vector<1x128xf32> to vector<1x32xf32>
    %169 = vector.extract_strided_slice %166 {offsets = [0, 64], sizes = [1, 32], strides = [1, 1]} : vector<1x128xf32> to vector<1x32xf32>
    %170 = vector.extract_strided_slice %165 {offsets = [0, 96], sizes = [1, 32], strides = [1, 1]} : vector<1x128xf32> to vector<1x32xf32>
    %171 = arith.mulf %168, %152 : vector<1x32xf32>
    %172 = arith.mulf %167, %169 : vector<1x32xf32>
    %173 = arith.addf %171, %172 : vector<1x32xf32>
    %174 = math.tanh %173 : vector<1x32xf32>
    %175 = arith.mulf %170, %174 : vector<1x32xf32>
    %176 = arith.index_cast %c7_i32 : i32 to index
    %c0_42 = arith.constant 0 : index
    %177 = vector.load %arg9[%176, %c0_42] : memref<8x32xf32, #tpu.memory_space<vmem>>, vector<1x32xf32>
    tpu.vector_store %arg9[%176, %c0_42], %175 {strides = array<i32>} : memref<8x32xf32, #tpu.memory_space<vmem>>, vector<1x32xf32>,
    %c8_i32 = arith.constant 8 : i32
    %c0_43 = arith.constant 0 : index
    %c0_44 = arith.constant 0 : index
    %178 = vector.load %arg9[%c0_43, %c0_44] : memref<8x32xf32, #tpu.memory_space<vmem>>, vector<8x32xf32>
    %c0_45 = arith.constant 0 : index
    %c0_46 = arith.constant 0 : index
    %179 = vector.load %arg5[%c0_45, %c0_46] : memref<1x32xf32, #tpu.memory_space<vmem>>, vector<1x32xf32>
    %180 = vector.broadcast %179 : vector<1x32xf32> to vector<8x32xf32>
    %181 = arith.mulf %178, %180 : vector<8x32xf32>
    %cst_47 = arith.constant dense<0.000000e+00> : vector<8xf32>
    %182 = vector.multi_reduction <add>, %181, %cst_47 [1] : vector<8x32xf32> to vector<8xf32>
    %183 = vector.shape_cast %182 : vector<8xf32> to vector<8x1xf32>
    %c0_48 = arith.constant 0 : index
    %c0_49 = arith.constant 0 : index
    %184 = vector.load %arg6[%c0_48, %c0_49] : memref<1x1xf32, #tpu.memory_space<vmem>>, vector<1x1xf32>
    %185 = vector.broadcast %184 : vector<1x1xf32> to vector<8x1xf32>
    %186 = arith.addf %183, %185 : vector<8x1xf32>
    %c0_50 = arith.constant 0 : index
    %c0_51 = arith.constant 0 : index
    %187 = vector.load %arg7[%c0_50, %c0_51] : memref<8x1xf32, #tpu.memory_space<vmem>>, vector<8x1xf32>
    tpu.vector_store %arg7[%c0_50, %c0_51], %186 {strides = array<i32>} : memref<8x1xf32, #tpu.memory_space<vmem>>, vector<8x1xf32>,
    return
  }
  func.func @transform_0(%arg0: i32) -> (i32, i32) {
    %c0_i32 = arith.constant 0 : i32
    %c0_i32_0 = arith.constant 0 : i32
    %c0_i32_1 = arith.constant 0 : i32
    return %c0_i32, %c0_i32_0 : i32, i32
  }
  func.func @transform_1(%arg0: i32) -> (i32, i32) {
    %c0_i32 = arith.constant 0 : i32
    %c0_i32_0 = arith.constant 0 : i32
    %c0_i32_1 = arith.constant 0 : i32
    return %c0_i32, %c0_i32_0 : i32, i32
  }
  func.func @transform_2(%arg0: i32) -> (i32, i32) {
    %c0_i32 = arith.constant 0 : i32
    %c0_i32_0 = arith.constant 0 : i32
    %c0_i32_1 = arith.constant 0 : i32
    return %c0_i32, %c0_i32_0 : i32, i32
  }
  func.func @transform_3(%arg0: i32) -> (i32, i32) {
    %c0_i32 = arith.constant 0 : i32
    %c0_i32_0 = arith.constant 0 : i32
    %c0_i32_1 = arith.constant 0 : i32
    return %c0_i32, %c0_i32_0 : i32, i32
  }
  func.func @transform_4(%arg0: i32) -> (i32, i32) {
    %c0_i32 = arith.constant 0 : i32
    %c0_i32_0 = arith.constant 0 : i32
    %c0_i32_1 = arith.constant 0 : i32
    return %c0_i32, %c0_i32_0 : i32, i32
  }
  func.func @transform_5(%arg0: i32) -> (i32, i32) {
    %c0_i32 = arith.constant 0 : i32
    %c0_i32_0 = arith.constant 0 : i32
    %c0_i32_1 = arith.constant 0 : i32
    return %c0_i32, %c0_i32_0 : i32, i32
  }
  func.func @transform_6(%arg0: i32) -> (i32, i32) {
    %c0_i32 = arith.constant 0 : i32
    %c0_i32_0 = arith.constant 0 : i32
    %c0_i32_1 = arith.constant 0 : i32
    return %c0_i32, %c0_i32_0 : i32, i32
  }
}

</mosaic_0001>

<bundles_post_ra>
// kernel: tpu_custom_call.1
= control target key start
LH: loop header
LB: loop body
LE: loop exit
PB: predicated region body
PF: predicated region fallthrough
CT: control target
= control target key end

     0   :  { %s938_s0 = inlined_call_operand.hbm [shape: f32[8,16], index: 0, kind: input, shape index: {}]   ;;  %s939_s1 = inlined_call_operand.hbm [shape: f32[16,128], index: 1, kind: input, shape index: {}]   ;;  %s940_s2 = inlined_call_operand.hbm [shape: f32[32,128], index: 2, kind: input, shape index: {}]   ;;  %s941_s3 = inlined_call_operand.vmem [shape: f32[1,128], index: 3, kind: input, shape index: {}]   ;;  %s942_s4 = inlined_call_operand.vmem [shape: f32[1,32], index: 4, kind: input, shape index: {}]   ;;  %s943_s5 = inlined_call_operand.<no memory space> [shape: f32[1,1], index: 5, kind: input, shape index: {}]   ;;  %s944_s6 = inlined_call_operand.vmem [shape: f32[8,1], index: 6, kind: output, shape index: {}]  }
   0x1   :  { %v11_v0 = vstv %s943_s5 }
   0x2   :  { %12 = vst [vmem:[#allocation4] sm:$0x1] %v11_v0 }
   0x3   :  { %13 = vsyncpa [#allocation6], 0 }
   0x4   :  { %14 = vsyncpa [#allocation8], 0  ;;  %s30_s25 = sshll.u32 %s939_s1, 4  ;;  %s826_s26 = smov [#allocation7]   ;;  %s31_s25 = int_to_ptr.hbm [resolvable:$true] %s30_s25 }
   0x5   :  { %s32_s27 = sshll.u32 %s826_s26, 4  ;;  %s20_s30 = sshll.u32 %s938_s0, 4  ;;  %s33_s27 = int_to_ptr.vmem [resolvable:$true] %s32_s27  ;;  %s21_s30 = int_to_ptr.hbm [resolvable:$true] %s20_s30 }
   0x6   :  { %s827_s7 = smov 128   ;;  %s828_s8 = smov 8  }
   0x7   :  { %38 = dma.hbm_to_vmem [thread:$0]  %s31_s25, 256, %s33_s27, [#allocation8], %s827_s7, %s827_s7, %s828_s8  }
   0x8   :  { %s829_s5 = smov [#allocation5]   ;;  %s43_s12 = sshll.u32 %s940_s2, 4  ;;  %s44_s12 = int_to_ptr.hbm [resolvable:$true] %s43_s12 }
   0x9   :  { %s22_s9 = sshll.u32 %s829_s5, 4  ;;  %s830_s1 = smov [#allocation9]   ;;  %s23_s9 = int_to_ptr.vmem [resolvable:$true] %s22_s9 }
   0xa   :  { %25 = dma.hbm_to_vmem [thread:$0]  %s21_s30, 128, %s23_s9, [#allocation6]  }
   0xb   :  { %s45_s13 = sshll.u32 %s830_s1, 4  ;;  %s46_s13 = int_to_ptr.vmem [resolvable:$true] %s45_s13 }
   0xc   :  { %51 = dma.hbm_to_vmem [thread:$0]  %s44_s12, 512, %s46_s13, [#allocation8], %s827_s7, %s827_s7, %s828_s8  }
   0xd   :  { %822 = dma.done.wait [#allocation6], 128  }
   0xe   :  { %823 = vsyncadd [#allocation6], 4294967168 }
   0xf   :  { %824 = dma.done.wait [#allocation8], 768  }
  0x10   :  { %825 = vsyncadd [#allocation8], 4294966528  ;;  %v72_v1 = vld [vmem:[#allocation7 + $0x8] sm:$0xff]  ;;  %v71_v2 = vld [vmem:[#allocation7] sm:$0xff]  ;;  %vm77_vm0 = vcmask 130048   ;;  %v831_v8 = vmov 0.0  }
  0x11   :  { %95 = vmatpush.msra.mxu0 %v72_v1  ;;  %v70_v3 = vld [vmem:[#allocation5] sm:$0xff]  ;;  %v105_v4 = vld [vmem:[#allocation9 + $0x18] sm:$0xff]  ;;  %v104_v5 = vld [vmem:[#allocation9 + $0x10] sm:$0xff]  ;;  %s832_s14 = smov 64   ;;  %vm173_vm5 = vcmask 253952   ;;  %vm107_vm6 = vcmask 261120  }
  0x12   :  { %123 = vmatpush.msra.mxu1 %v105_v4  ;;  %190 = vmatpush.msra.mxu2 %v105_v4  ;;  %v103_v6 = vld [vmem:[#allocation9 + $0x8] sm:$0xff]  ;;  %v102_v7 = vld [vmem:[#allocation9] sm:$0xff]  ;;  %v683_v9 = vld [vmem:[%s941_s3] ss:$0 sm:$0xff]  ;;  %s833_s3 = smov 32  }
  0x13   :  { %96 = vmatpush.msra.mxu0 %v71_v2  ;;  %256 = vmatpush.msra.mxu3 %v105_v4 }
  0x14   :  { %659 = vmatmul.msk.f32.vlgmr.msra.gmra.mxu0 %vm77_vm0, %v70_v3  ;;  %124 = vmatpush.msra.mxu1 %v104_v5 }
  0x15   :  { %191 = vmatpush.msra.mxu2 %v104_v5  ;;  %257 = vmatpush.msra.mxu3 %v104_v5 }
  0x16   :  { %125 = vmatpush.msra.mxu1 %v103_v6  ;;  %322 = vmatpush.msrb.mxu0 %v105_v4 }
  0x17   :  { %192 = vmatpush.msra.mxu2 %v103_v6  ;;  %258 = vmatpush.msra.mxu3 %v103_v6 }
  0x18   :  { %126 = vmatpush.msra.mxu1 %v102_v7  ;;  %323 = vmatpush.msrb.mxu0 %v104_v5 }
  0x19   :  { %127 = vmatmul.f32.vlgmr.msra.gmra.mxu1 %v831_v8  ;;  %193 = vmatpush.msra.mxu2 %v102_v7 }
  0x1a   :  { %259 = vmatpush.msra.mxu3 %v102_v7  ;;  %324 = vmatpush.msrb.mxu0 %v103_v6 }
  0x1b   :  { %388 = vmatpush.msrb.mxu1 %v105_v4  ;;  %454 = vmatpush.msrb.mxu2 %v105_v4 }
  0x1c   :  { %325 = vmatpush.msrb.mxu0 %v102_v7  ;;  %520 = vmatpush.msrb.mxu3 %v105_v4 }
  0x1d   :  { %389 = vmatpush.msrb.mxu1 %v104_v5  ;;  %455 = vmatpush.msrb.mxu2 %v104_v5 }
  0x1e   :  { %521 = vmatpush.msrb.mxu3 %v104_v5  ;;  %586 = vmatpush.msra.mxu0 %v105_v4 }
  0x1f   :  { %390 = vmatpush.msrb.mxu1 %v103_v6  ;;  %456 = vmatpush.msrb.mxu2 %v103_v6 }
  0x20   :  { %522 = vmatpush.msrb.mxu3 %v103_v6  ;;  %587 = vmatpush.msra.mxu0 %v104_v5 }
  0x21   :  { %391 = vmatpush.msrb.mxu1 %v102_v7  ;;  %457 = vmatpush.msrb.mxu2 %v102_v7 }
  0x22   :  { %523 = vmatpush.msrb.mxu3 %v102_v7  ;;  %588 = vmatpush.msra.mxu0 %v103_v6 }
  0x24   :  { %589 = vmatpush.msra.mxu0 %v102_v7 }
  0x91   :  { %v98_v10 = vpop.f32.mrf.mxu0 }
  0x92   :  { %v99_v11 = vadd.f32 %v683_v9, %v98_v10 }
  0x94   :  { %101 = vst [vmem:[#allocation2] sm:$0xff] %v99_v11 }
  0x96   :  { %v128_v12 = vpop.f32.mrf.mxu1 }
  0x9b   :  { %v106_v13 = vld [vmem:[#allocation2] sm:$0x1]  ;;  %v175_v38 = vld [vmem:[#allocation2 + $0x1] sm:$0x1]  ;;  %v241_v0 = vld [vmem:[#allocation2 + $0x2] sm:$0x1] }
  0x9c   :  { %v131_v14 = vadd.f32 %v128_v12, %v106_v13 }
  0x9e   :  { %686 = vtanh.f32 %v131_v14  ;;  %v660_v16 = vmul.f32 -1.442695, %v131_v14 }
  0xa0   :  { %688 = vpow2.f32 %v660_v16 }
  0xa4   :  { %v687_v15 = vpop.eup %686 }
  0xa5   :  { %154 = vrot.lane.b32.xlu0 %v687_v15, %s832_s14 }
  0xa6   :  { %v689_v17 = vpop.eup %688 }
  0xa7   :  { %v135_v18 = vadd.f32 1.0, %v689_v17 }
  0xa9   :  { %690 = vrcp.f32 %v135_v18  ;;  %v147_v24 = vand.u32 2147483648, %v135_v18  ;;  %vm141_vm2 = vweird.f32 %v135_v18  ;;  %v145_v25 = vand.u32 2147483647, %v135_v18 }
  0xab   :  { %v148_v27 = vor.u32 1.1754944e-38, %v147_v24  ;;  %vm146_vm4 = vcmp.eq.f32.partialorder %v145_v25, 8.507059e+37 }
  0xaf   :  { %v691_v19 = vpop.eup %690 }
  0xb0   :  { %v137_v20 = vmul.f32 %v691_v19, %v135_v18  ;;  %vm142_vm1 = vweird.f32 %v691_v19 }
  0xb1   :  { %vm143_vm3 = vmor %vm141_vm2, %vm142_vm1 }
  0xb2   :  { %v138_v21 = vsub.f32 1.0, %v137_v20 }
  0xb4   :  { %v139_v22 = vmul.f32 %v691_v19, %v138_v21 }
  0xb6   :  { %v140_v23 = vadd.f32 %v691_v19, %v139_v22 }
  0xb8   :  { %v144_v26 = vsel %vm143_vm3, %v691_v19, %v140_v23 }
  0xb9   :  { %v149_v29 = vsel %vm146_vm4, %v148_v27, %v144_v26  ;;  %v307_v26 = vld [vmem:[#allocation2 + $0x3] sm:$0x1] }
  0xba   :  { %v152_v31 = vmul.f32 0.0, %v149_v29 }
 0x117   :  { %v155_v28 = vpop.permute.xlu0 %154 }
 0x118   :  { %v157_v30 = vmul.f32 %v155_v28, %v149_v29 }
 0x11a   :  { %159 = vrot.lane.b32.xlu0 %v157_v30, %s833_s3 }
 0x18c   :  { %v160_v32 = vpop.permute.xlu0 %159 }
 0x18d   :  { %v162_v33 = vadd.f32 %v160_v32, %v152_v31 }
 0x18f   :  { %692 = vtanh.f32 %v162_v33 }
 0x195   :  { %v693_v34 = vpop.eup %692 }
 0x196   :  { %165 = vrot.lane.b32.xlu1 %v693_v34, %s832_s14 }
 0x208   :  { %v166_v35 = vpop.permute.xlu1 %165 }
 0x209   :  { %v168_v36 = vmul.f32 %v166_v35, %v149_v29 }
 0x20b   :  { %170 = vrot.lane.b32.xlu1 %v168_v36, %s833_s3 }
 0x27d   :  { %v171_v37 = vpop.permute.xlu1 %170 }
 0x27e   :  { %174 = vst.msk [vmem:[#allocation3] sm:$0x1] %vm173_vm5, %v171_v37  ;;  %661 = vmatmul.msk.f32.vlgmr.msra.gmra.mxu2 %vm107_vm6, %v171_v37 }
 0x301   :  { %v195_v39 = vpop.f32.mrf.mxu2 }
 0x302   :  { %v198_v40 = vadd.f32 %v195_v39, %v175_v38 }
 0x304   :  { %694 = vtanh.f32 %v198_v40  ;;  %v662_v42 = vmul.f32 -1.442695, %v198_v40 }
 0x306   :  { %696 = vpow2.f32 %v662_v42 }
 0x30a   :  { %v695_v41 = vpop.eup %694 }
 0x30b   :  { %221 = vrot.lane.b32.xlu2 %v695_v41, %s832_s14 }
 0x30c   :  { %v697_v43 = vpop.eup %696 }
 0x30d   :  { %v202_v44 = vadd.f32 1.0, %v697_v43 }
 0x30f   :  { %698 = vrcp.f32 %v202_v44  ;;  %v214_v50 = vand.u32 2147483648, %v202_v44  ;;  %vm208_vm8 = vweird.f32 %v202_v44  ;;  %v212_v51 = vand.u32 2147483647, %v202_v44 }
 0x311   :  { %v215_v53 = vor.u32 1.1754944e-38, %v214_v50  ;;  %vm213_vm10 = vcmp.eq.f32.partialorder %v212_v51, 8.507059e+37 }
 0x315   :  { %v699_v45 = vpop.eup %698 }
 0x316   :  { %v204_v46 = vmul.f32 %v699_v45, %v202_v44  ;;  %vm209_vm7 = vweird.f32 %v699_v45 }
 0x317   :  { %vm210_vm9 = vmor %vm208_vm8, %vm209_vm7 }
 0x318   :  { %v205_v47 = vsub.f32 1.0, %v204_v46 }
 0x31a   :  { %v206_v48 = vmul.f32 %v699_v45, %v205_v47 }
 0x31c   :  { %v207_v49 = vadd.f32 %v699_v45, %v206_v48 }
 0x31e   :  { %v211_v52 = vsel %vm210_vm9, %v699_v45, %v207_v49 }
 0x31f   :  { %v216_v55 = vsel %vm213_vm10, %v215_v53, %v211_v52  ;;  %v373_v52 = vld [vmem:[#allocation2 + $0x4] sm:$0x1] }
 0x320   :  { %v219_v57 = vmul.f32 %v216_v55, %v162_v33 }
 0x365   :  { %v222_v54 = vpop.permute.xlu2 %221 }
 0x366   :  { %v224_v56 = vmul.f32 %v222_v54, %v216_v55 }
 0x368   :  { %226 = vrot.lane.b32.xlu2 %v224_v56, %s833_s3 }
 0x3c2   :  { %v227_v58 = vpop.permute.xlu2 %226 }
 0x3c3   :  { %v229_v59 = vadd.f32 %v227_v58, %v219_v57 }
 0x3c5   :  { %700 = vtanh.f32 %v229_v59 }
 0x3cb   :  { %v701_v60 = vpop.eup %700 }
 0x3cc   :  { %232 = vrot.lane.b32.xlu0 %v701_v60, %s832_s14 }
 0x43e   :  { %v233_v61 = vpop.permute.xlu0 %232 }
 0x43f   :  { %v235_v62 = vmul.f32 %v233_v61, %v216_v55 }
 0x441   :  { %237 = vrot.lane.b32.xlu1 %v235_v62, %s833_s3 }
 0x4b3   :  { %v238_v63 = vpop.permute.xlu1 %237 }
 0x4b4   :  { %240 = vst.msk [vmem:[#allocation3 + $0x1] sm:$0x1] %vm173_vm5, %v238_v63  ;;  %663 = vmatmul.msk.f32.vlgmr.msra.gmra.mxu3 %vm107_vm6, %v238_v63 }
 0x537   :  { %v261_v1 = vpop.f32.mrf.mxu3 }
 0x538   :  { %v264_v2 = vadd.f32 %v261_v1, %v241_v0 }
 0x53a   :  { %702 = vtanh.f32 %v264_v2  ;;  %v664_v4 = vmul.f32 -1.442695, %v264_v2 }
 0x53c   :  { %704 = vpow2.f32 %v664_v4 }
 0x540   :  { %v703_v3 = vpop.eup %702 }
 0x541   :  { %287 = vrot.lane.b32.xlu2 %v703_v3, %s832_s14 }
 0x542   :  { %v705_v5 = vpop.eup %704 }
 0x543   :  { %v268_v6 = vadd.f32 1.0, %v705_v5 }
 0x545   :  { %706 = vrcp.f32 %v268_v6  ;;  %v280_v12 = vand.u32 2147483648, %v268_v6  ;;  %vm274_vm12 = vweird.f32 %v268_v6  ;;  %v278_v13 = vand.u32 2147483647, %v268_v6 }
 0x547   :  { %v281_v15 = vor.u32 1.1754944e-38, %v280_v12  ;;  %vm279_vm14 = vcmp.eq.f32.partialorder %v278_v13, 8.507059e+37 }
 0x54b   :  { %v707_v7 = vpop.eup %706 }
 0x54c   :  { %v270_v8 = vmul.f32 %v707_v7, %v268_v6  ;;  %vm275_vm11 = vweird.f32 %v707_v7 }
 0x54d   :  { %vm276_vm13 = vmor %vm274_vm12, %vm275_vm11 }
 0x54e   :  { %v271_v9 = vsub.f32 1.0, %v270_v8 }
 0x550   :  { %v272_v10 = vmul.f32 %v707_v7, %v271_v9 }
 0x552   :  { %v273_v11 = vadd.f32 %v707_v7, %v272_v10 }
 0x554   :  { %v277_v14 = vsel %vm276_vm13, %v707_v7, %v273_v11 }
 0x555   :  { %v282_v17 = vsel %vm279_vm14, %v281_v15, %v277_v14  ;;  %v439_v14 = vld [vmem:[#allocation2 + $0x5] sm:$0x1] }
 0x556   :  { %v285_v19 = vmul.f32 %v282_v17, %v229_v59 }
 0x59b   :  { %v288_v16 = vpop.permute.xlu2 %287 }
 0x59c   :  { %v290_v18 = vmul.f32 %v288_v16, %v282_v17 }
 0x59e   :  { %292 = vrot.lane.b32.xlu0 %v290_v18, %s833_s3 }
 0x610   :  { %v293_v20 = vpop.permute.xlu0 %292 }
 0x611   :  { %v295_v21 = vadd.f32 %v293_v20, %v285_v19 }
 0x613   :  { %708 = vtanh.f32 %v295_v21 }
 0x619   :  { %v709_v22 = vpop.eup %708 }
 0x61a   :  { %298 = vrot.lane.b32.xlu1 %v709_v22, %s832_s14 }
 0x68c   :  { %v299_v23 = vpop.permute.xlu1 %298 }
 0x68d   :  { %v301_v24 = vmul.f32 %v299_v23, %v282_v17 }
 0x68f   :  { %303 = vrot.lane.b32.xlu2 %v301_v24, %s833_s3 }
 0x6e9   :  { %v304_v25 = vpop.permute.xlu2 %303 }
 0x6ea   :  { %306 = vst.msk [vmem:[#allocation3 + $0x2] sm:$0x1] %vm173_vm5, %v304_v25  ;;  %665 = vmatmul.msk.f32.vlgmr.msrb.gmra.mxu0 %vm107_vm6, %v304_v25 }
 0x767   :  { %v327_v27 = vpop.f32.mrf.mxu0 }
 0x768   :  { %v330_v28 = vadd.f32 %v327_v27, %v307_v26 }
 0x76a   :  { %710 = vtanh.f32 %v330_v28  ;;  %v666_v30 = vmul.f32 -1.442695, %v330_v28 }
 0x76c   :  { %712 = vpow2.f32 %v666_v30 }
 0x770   :  { %v711_v29 = vpop.eup %710 }
 0x771   :  { %353 = vrot.lane.b32.xlu0 %v711_v29, %s832_s14 }
 0x772   :  { %v713_v31 = vpop.eup %712 }
 0x773   :  { %v334_v32 = vadd.f32 1.0, %v713_v31 }
 0x775   :  { %714 = vrcp.f32 %v334_v32  ;;  %v346_v38 = vand.u32 2147483648, %v334_v32  ;;  %vm340_vm0 = vweird.f32 %v334_v32  ;;  %v344_v39 = vand.u32 2147483647, %v334_v32 }
 0x777   :  { %v347_v41 = vor.u32 1.1754944e-38, %v346_v38  ;;  %vm345_vm2 = vcmp.eq.f32.partialorder %v344_v39, 8.507059e+37 }
 0x77b   :  { %v715_v33 = vpop.eup %714 }
 0x77c   :  { %v336_v34 = vmul.f32 %v715_v33, %v334_v32  ;;  %vm341_vm15 = vweird.f32 %v715_v33 }
 0x77d   :  { %vm342_vm1 = vmor %vm340_vm0, %vm341_vm15 }
 0x77e   :  { %v337_v35 = vsub.f32 1.0, %v336_v34 }
 0x780   :  { %v338_v36 = vmul.f32 %v715_v33, %v337_v35 }
 0x782   :  { %v339_v37 = vadd.f32 %v715_v33, %v338_v36 }
 0x784   :  { %v343_v40 = vsel %vm342_vm1, %v715_v33, %v339_v37 }
 0x785   :  { %v348_v43 = vsel %vm345_vm2, %v347_v41, %v343_v40  ;;  %v505_v40 = vld [vmem:[#allocation2 + $0x6] sm:$0x1] }
 0x786   :  { %v351_v45 = vmul.f32 %v348_v43, %v295_v21 }
 0x7e3   :  { %v354_v42 = vpop.permute.xlu0 %353 }
 0x7e4   :  { %v356_v44 = vmul.f32 %v354_v42, %v348_v43 }
 0x7e6   :  { %358 = vrot.lane.b32.xlu1 %v356_v44, %s833_s3 }
 0x858   :  { %v359_v46 = vpop.permute.xlu1 %358 }
 0x859   :  { %v361_v47 = vadd.f32 %v359_v46, %v351_v45 }
 0x85b   :  { %716 = vtanh.f32 %v361_v47 }
 0x861   :  { %v717_v48 = vpop.eup %716 }
 0x862   :  { %364 = vrot.lane.b32.xlu2 %v717_v48, %s832_s14 }
 0x8bc   :  { %v365_v49 = vpop.permute.xlu2 %364 }
 0x8bd   :  { %v367_v50 = vmul.f32 %v365_v49, %v348_v43 }
 0x8bf   :  { %369 = vrot.lane.b32.xlu0 %v367_v50, %s833_s3 }
 0x931   :  { %v370_v51 = vpop.permute.xlu0 %369 }
 0x932   :  { %372 = vst.msk [vmem:[#allocation3 + $0x3] sm:$0x1] %vm173_vm5, %v370_v51  ;;  %667 = vmatmul.msk.f32.vlgmr.msrb.gmra.mxu1 %vm107_vm6, %v370_v51 }
 0x9af   :  { %v393_v53 = vpop.f32.mrf.mxu1 }
 0x9b0   :  { %v396_v54 = vadd.f32 %v393_v53, %v373_v52 }
 0x9b2   :  { %718 = vtanh.f32 %v396_v54  ;;  %v668_v56 = vmul.f32 -1.442695, %v396_v54 }
 0x9b4   :  { %720 = vpow2.f32 %v668_v56 }
 0x9b8   :  { %v719_v55 = vpop.eup %718 }
 0x9b9   :  { %419 = vrot.lane.b32.xlu1 %v719_v55, %s832_s14 }
 0x9ba   :  { %v721_v57 = vpop.eup %720 }
 0x9bb   :  { %v400_v58 = vadd.f32 1.0, %v721_v57 }
 0x9bd   :  { %722 = vrcp.f32 %v400_v58  ;;  %v412_v0 = vand.u32 2147483648, %v400_v58  ;;  %vm406_vm4 = vweird.f32 %v400_v58  ;;  %v410_v1 = vand.u32 2147483647, %v400_v58 }
 0x9bf   :  { %v413_v3 = vor.u32 1.1754944e-38, %v412_v0  ;;  %vm411_vm8 = vcmp.eq.f32.partialorder %v410_v1, 8.507059e+37 }
 0x9c3   :  { %v723_v59 = vpop.eup %722 }
 0x9c4   :  { %v402_v60 = vmul.f32 %v723_v59, %v400_v58  ;;  %vm407_vm3 = vweird.f32 %v723_v59 }
 0x9c5   :  { %vm408_vm7 = vmor %vm406_vm4, %vm407_vm3 }
 0x9c6   :  { %v403_v61 = vsub.f32 1.0, %v402_v60 }
 0x9c8   :  { %v404_v62 = vmul.f32 %v723_v59, %v403_v61 }
 0x9ca   :  { %v405_v63 = vadd.f32 %v723_v59, %v404_v62 }
 0x9cc   :  { %v409_v2 = vsel %vm408_vm7, %v723_v59, %v405_v63  ;;  %vm651_vm7 = vcmask 7168  }
 0x9cd   :  { %v414_v5 = vsel %vm411_vm8, %v413_v3, %v409_v2  ;;  %v571_v2 = vld [vmem:[#allocation2 + $0x7] sm:$0x1] }
 0x9ce   :  { %v417_v7 = vmul.f32 %v414_v5, %v361_v47 }
 0xa2b   :  { %v420_v4 = vpop.permute.xlu1 %419 }
 0xa2c   :  { %v422_v6 = vmul.f32 %v420_v4, %v414_v5 }
 0xa2e   :  { %424 = vrot.lane.b32.xlu2 %v422_v6, %s833_s3 }
 0xa88   :  { %v425_v8 = vpop.permute.xlu2 %424 }
 0xa89   :  { %v427_v9 = vadd.f32 %v425_v8, %v417_v7 }
 0xa8b   :  { %724 = vtanh.f32 %v427_v9 }
 0xa91   :  { %v725_v10 = vpop.eup %724 }
 0xa92   :  { %430 = vrot.lane.b32.xlu0 %v725_v10, %s832_s14 }
 0xb04   :  { %v431_v11 = vpop.permute.xlu0 %430 }
 0xb05   :  { %v433_v12 = vmul.f32 %v431_v11, %v414_v5 }
 0xb07   :  { %435 = vrot.lane.b32.xlu1 %v433_v12, %s833_s3 }
 0xb79   :  { %v436_v13 = vpop.permute.xlu1 %435 }
 0xb7a   :  { %438 = vst.msk [vmem:[#allocation3 + $0x4] sm:$0x1] %vm173_vm5, %v436_v13  ;;  %669 = vmatmul.msk.f32.vlgmr.msrb.gmra.mxu2 %vm107_vm6, %v436_v13 }
 0xbfd   :  { %v459_v15 = vpop.f32.mrf.mxu2 }
 0xbfe   :  { %v462_v16 = vadd.f32 %v459_v15, %v439_v14 }
 0xc00   :  { %726 = vtanh.f32 %v462_v16  ;;  %v670_v18 = vmul.f32 -1.442695, %v462_v16 }
 0xc02   :  { %728 = vpow2.f32 %v670_v18 }
 0xc06   :  { %v727_v17 = vpop.eup %726 }
 0xc07   :  { %485 = vrot.lane.b32.xlu2 %v727_v17, %s832_s14 }
 0xc08   :  { %v729_v19 = vpop.eup %728 }
 0xc09   :  { %v466_v20 = vadd.f32 1.0, %v729_v19 }
 0xc0b   :  { %730 = vrcp.f32 %v466_v20  ;;  %v478_v26 = vand.u32 2147483648, %v466_v20  ;;  %vm472_vm10 = vweird.f32 %v466_v20  ;;  %v476_v27 = vand.u32 2147483647, %v466_v20 }
 0xc0d   :  { %v479_v29 = vor.u32 1.1754944e-38, %v478_v26  ;;  %vm477_vm12 = vcmp.eq.f32.partialorder %v476_v27, 8.507059e+37 }
 0xc11   :  { %v731_v21 = vpop.eup %730 }
 0xc12   :  { %v468_v22 = vmul.f32 %v731_v21, %v466_v20  ;;  %vm473_vm9 = vweird.f32 %v731_v21 }
 0xc13   :  { %vm474_vm11 = vmor %vm472_vm10, %vm473_vm9 }
 0xc14   :  { %v469_v23 = vsub.f32 1.0, %v468_v22 }
 0xc16   :  { %v470_v24 = vmul.f32 %v731_v21, %v469_v23 }
 0xc18   :  { %v471_v25 = vadd.f32 %v731_v21, %v470_v24 }
 0xc1a   :  { %v475_v28 = vsel %vm474_vm11, %v731_v21, %v471_v25 }
 0xc1b   :  { %v480_v31 = vsel %vm477_vm12, %v479_v29, %v475_v28  ;;  %v684_v28 = vld [vmem:[%s942_s4] ss:$0 sm:$0xff] }
 0xc1c   :  { %v483_v33 = vmul.f32 %v480_v31, %v427_v9 }
 0xc61   :  { %v486_v30 = vpop.permute.xlu2 %485 }
 0xc62   :  { %v488_v32 = vmul.f32 %v486_v30, %v480_v31 }
 0xc64   :  { %490 = vrot.lane.b32.xlu0 %v488_v32, %s833_s3  ;;  %v685_v32 = vld [vmem:[#allocation4] ss:$0 sm:$0xff] }
 0xcd6   :  { %v491_v34 = vpop.permute.xlu0 %490 }
 0xcd7   :  { %v493_v35 = vadd.f32 %v491_v34, %v483_v33 }
 0xcd9   :  { %732 = vtanh.f32 %v493_v35 }
 0xcdf   :  { %v733_v36 = vpop.eup %732 }
 0xce0   :  { %496 = vrot.lane.b32.xlu1 %v733_v36, %s832_s14 }
 0xd52   :  { %v497_v37 = vpop.permute.xlu1 %496 }
 0xd53   :  { %v499_v38 = vmul.f32 %v497_v37, %v480_v31 }
 0xd55   :  { %501 = vrot.lane.b32.xlu2 %v499_v38, %s833_s3 }
 0xdaf   :  { %v502_v39 = vpop.permute.xlu2 %501 }
 0xdb0   :  { %504 = vst.msk [vmem:[#allocation3 + $0x5] sm:$0x1] %vm173_vm5, %v502_v39  ;;  %671 = vmatmul.msk.f32.vlgmr.msrb.gmra.mxu3 %vm107_vm6, %v502_v39 }
 0xe33   :  { %v525_v41 = vpop.f32.mrf.mxu3 }
 0xe34   :  { %v528_v42 = vadd.f32 %v525_v41, %v505_v40 }
 0xe36   :  { %734 = vtanh.f32 %v528_v42  ;;  %v672_v44 = vmul.f32 -1.442695, %v528_v42 }
 0xe38   :  { %736 = vpow2.f32 %v672_v44 }
 0xe3c   :  { %v735_v43 = vpop.eup %734 }
 0xe3d   :  { %551 = vrot.lane.b32.xlu0 %v735_v43, %s832_s14 }
 0xe3e   :  { %v737_v45 = vpop.eup %736 }
 0xe3f   :  { %v532_v46 = vadd.f32 1.0, %v737_v45 }
 0xe41   :  { %738 = vrcp.f32 %v532_v46  ;;  %v544_v52 = vand.u32 2147483648, %v532_v46  ;;  %vm538_vm14 = vweird.f32 %v532_v46  ;;  %v542_v53 = vand.u32 2147483647, %v532_v46 }
 0xe43   :  { %v545_v55 = vor.u32 1.1754944e-38, %v544_v52  ;;  %vm543_vm0 = vcmp.eq.f32.partialorder %v542_v53, 8.507059e+37 }
 0xe47   :  { %v739_v47 = vpop.eup %738 }
 0xe48   :  { %v534_v48 = vmul.f32 %v739_v47, %v532_v46  ;;  %vm539_vm13 = vweird.f32 %v739_v47 }
 0xe49   :  { %vm540_vm15 = vmor %vm538_vm14, %vm539_vm13 }
 0xe4a   :  { %v535_v49 = vsub.f32 1.0, %v534_v48 }
 0xe4c   :  { %v536_v50 = vmul.f32 %v739_v47, %v535_v49 }
 0xe4e   :  { %v537_v51 = vadd.f32 %v739_v47, %v536_v50 }
 0xe50   :  { %v541_v54 = vsel %vm540_vm15, %v739_v47, %v537_v51 }
 0xe51   :  { %v546_v57 = vsel %vm543_vm0, %v545_v55, %v541_v54 }
 0xe52   :  { %v549_v59 = vmul.f32 %v546_v57, %v493_v35 }
 0xeaf   :  { %v552_v56 = vpop.permute.xlu0 %551 }
 0xeb0   :  { %v554_v58 = vmul.f32 %v552_v56, %v546_v57 }
 0xeb2   :  { %556 = vrot.lane.b32.xlu1 %v554_v58, %s833_s3 }
 0xf24   :  { %v557_v60 = vpop.permute.xlu1 %556 }
 0xf25   :  { %v559_v61 = vadd.f32 %v557_v60, %v549_v59 }
 0xf27   :  { %740 = vtanh.f32 %v559_v61 }
 0xf2d   :  { %v741_v62 = vpop.eup %740 }
 0xf2e   :  { %562 = vrot.lane.b32.xlu2 %v741_v62, %s832_s14 }
 0xf88   :  { %v563_v63 = vpop.permute.xlu2 %562 }
 0xf89   :  { %v565_v0 = vmul.f32 %v563_v63, %v546_v57 }
 0xf8b   :  { %567 = vrot.lane.b32.xlu0 %v565_v0, %s833_s3 }
 0xffd   :  { %v568_v1 = vpop.permute.xlu0 %567 }
 0xffe   :  { %570 = vst.msk [vmem:[#allocation3 + $0x6] sm:$0x1] %vm173_vm5, %v568_v1  ;;  %673 = vmatmul.msk.f32.vlgmr.msra.gmra.mxu0 %vm107_vm6, %v568_v1 }
0x107b   :  { %v591_v3 = vpop.f32.mrf.mxu0 }
0x107c   :  { %v594_v4 = vadd.f32 %v591_v3, %v571_v2 }
0x107e   :  { %742 = vtanh.f32 %v594_v4  ;;  %v674_v6 = vmul.f32 -1.442695, %v594_v4 }
0x1080   :  { %744 = vpow2.f32 %v674_v6 }
0x1084   :  { %v743_v5 = vpop.eup %742 }
0x1085   :  { %617 = vrot.lane.b32.xlu1 %v743_v5, %s832_s14 }
0x1086   :  { %v745_v7 = vpop.eup %744 }
0x1087   :  { %v598_v8 = vadd.f32 1.0, %v745_v7 }
0x1089   :  { %746 = vrcp.f32 %v598_v8  ;;  %v610_v14 = vand.u32 2147483648, %v598_v8  ;;  %vm604_vm2 = vweird.f32 %v598_v8  ;;  %v608_v15 = vand.u32 2147483647, %v598_v8 }
0x108b   :  { %v611_v17 = vor.u32 1.1754944e-38, %v610_v14  ;;  %vm609_vm4 = vcmp.eq.f32.partialorder %v608_v15, 8.507059e+37 }
0x108f   :  { %v747_v9 = vpop.eup %746 }
0x1090   :  { %v600_v10 = vmul.f32 %v747_v9, %v598_v8  ;;  %vm605_vm1 = vweird.f32 %v747_v9 }
0x1091   :  { %vm606_vm3 = vmor %vm604_vm2, %vm605_vm1 }
0x1092   :  { %v601_v11 = vsub.f32 1.0, %v600_v10 }
0x1094   :  { %v602_v12 = vmul.f32 %v747_v9, %v601_v11 }
0x1096   :  { %v603_v13 = vadd.f32 %v747_v9, %v602_v12 }
0x1098   :  { %v607_v16 = vsel %vm606_vm3, %v747_v9, %v603_v13 }
0x1099   :  { %v612_v19 = vsel %vm609_vm4, %v611_v17, %v607_v16 }
0x109a   :  { %v615_v21 = vmul.f32 %v612_v19, %v559_v61 }
0x10f7   :  { %v618_v18 = vpop.permute.xlu1 %617 }
0x10f8   :  { %v620_v20 = vmul.f32 %v618_v18, %v612_v19 }
0x10fa   :  { %622 = vrot.lane.b32.xlu2 %v620_v20, %s833_s3 }
0x1154   :  { %v623_v22 = vpop.permute.xlu2 %622 }
0x1155   :  { %v625_v23 = vadd.f32 %v623_v22, %v615_v21 }
0x1157   :  { %748 = vtanh.f32 %v625_v23 }
0x115d   :  { %v749_v24 = vpop.eup %748 }
0x115e   :  { %628 = vrot.lane.b32.xlu0 %v749_v24, %s832_s14 }
0x11d0   :  { %v629_v25 = vpop.permute.xlu0 %628 }
0x11d1   :  { %v631_v26 = vmul.f32 %v629_v25, %v612_v19 }
0x11d3   :  { %633 = vrot.lane.b32.xlu1 %v631_v26, %s833_s3 }
0x1245   :  { %v634_v27 = vpop.permute.xlu1 %633 }
0x1246   :  { %636 = vst.msk [vmem:[#allocation3 + $0x7] sm:$0x1] %vm173_vm5, %v634_v27 }
0x124d   :  { %v637_v29 = vld [vmem:[#allocation3] sm:$0xff] }
0x124e   :  { %v642_v30 = vmul.f32 %v684_v28, %v637_v29 }
0x1250   :  { %v643_v31 = vsel %vm107_vm6, %v642_v30, 0.0 }
0x1251   :  { %644 = vadd.xlane.f32.xlu2 %v643_v31 }
0x12c4   :  { %v645_v33 = vpop.xlane.xlu2 %644 }
0x12c5   :  { %v650_v34 = vadd.f32 %v685_v32, %v645_v33 }
0x12c7   :  { %652 = vst.msk [vmem:[%s944_s6] sm:$0xff] %vm651_vm7, %v650_v34 }
0x12c8   :  { %657 = vsyncpa [#allocation6], 1 }
0x12c9   :  { %658 = vsyncpa [#allocation8], 1 }

</bundles_post_ra>
